<compile_context>
chip_gen: v6e
topology: v6e:2x2x1
jax: 0.10.0
libtpu: 0.0.40
codegen_flags: <defaults>
</compile_context>

<pallas_src>
import jax
import jax.numpy as jnp
from jax.experimental import pallas as pl
from jax.experimental.pallas import tpu as pltpu


def pa_kernel(x_ref, w1_ref, p_ref, o_ref):
    # x_ref : (BN, C, TM)  channels on sublanes, pixels on the 128-lane axis
    # w1_ref: (Cr, C)      first 1x1 conv weight, in x.dtype (native MXU path)
    # p_ref : (Cr, 3) f32  column 0 = b1, column 1 = w2, p[0, 2] = b2
    # o_ref : (BN, C, TM)
    w1 = w1_ref[...]                 # (Cr, C)
    b1 = p_ref[:, 0:1]               # (Cr, 1) f32
    w2 = p_ref[:, 1:2]               # (Cr, 1) f32
    b2 = p_ref[0:1, 2:3]             # (1, 1)  f32

    def one_sample(b):
        x = x_ref[b]                                               # (C, TM)
        # conv1x1 (C -> Cr) + bias + ReLU: MXU matmul, f32 accumulation.
        h = jnp.dot(w1, x, preferred_element_type=jnp.float32) + b1
        h = jnp.maximum(h, 0.0)
        # conv1x1 (Cr -> 1) + bias: cheap sublane reduction -> (1, TM) (XLU).
        y = jnp.sum(h * w2, axis=0, keepdims=True) + b2
        y = jax.nn.sigmoid(y)                                      # EUP
        # Pixel attention: broadcast y over the channel (sublane) axis.
        o_ref[b] = x * y.astype(x.dtype)

    bn = x_ref.shape[0]
    if bn <= 8:
        # Small static batch block: unroll for LLO scheduler visibility.
        for b in range(bn):
            one_sample(b)
    else:
        def body(b, carry):
            one_sample(b)
            return carry
        jax.lax.fori_loop(0, bn, body, 0)


def pa_layer(x_nchw, w1, b1, w2, b2, *, target_block_bytes=4 * 1024 * 1024):
    """PALayer forward.

    x_nchw: (N, C, H, W); w1: (Cr, C, 1, 1); b1: (Cr,); w2: (1, Cr, 1, 1); b2: (1,).
    `target_block_bytes` ~ bytes of x per grid step (same again for the output).
    """
    N, C, H, W = x_nchw.shape
    Cr = w1.shape[0]
    assert Cr >= 1, "PALayer needs channel >= 8 (Cr = channel // 8)"
    HW = H * W
    elem = x_nchw.dtype.itemsize

    # NCHW-native: (N, C, H*W) is a free reshape — no transpose passes.
    x_flat = x_nchw.reshape(N, C, HW)

    # ---- pixel tile (lane axis): as big as the per-step byte budget allows ----
    row_bytes = C * elem
    tm_budget = max(128, (target_block_bytes // row_bytes) // 128 * 128)
    if HW <= tm_budget:
        tm = HW                      # full extent — legal for any HW
    else:
        tm = tm_budget               # multiple of 128; ragged tail handled by Pallas
    n_pix = pl.cdiv(HW, tm)

    # ---- batch block: pack samples per step when a whole image fits one tile ----
    if n_pix == 1:
        per_sample = C * HW * elem
        bn = int(max(1, min(N, target_block_bytes // max(per_sample, 1))))
    else:
        bn = 1
    n_batch = pl.cdiv(N, bn)

    # ---- v7x: keep >= 2 grid points along the parallel axes when possible ----
    if n_batch * n_pix == 1:
        if N >= 2:
            bn = max(1, N // 2)
            n_batch = pl.cdiv(N, bn)
        elif HW >= 256:
            tm = max(128, ((HW // 2) // 128) * 128)
            n_pix = pl.cdiv(HW, tm)

    # Tiny conv operands (constant index_map -> DMA'd once, then reused).
    # w1 stays in x.dtype so bf16 inputs take the native bf16 MXU path (f32 acc).
    w1_mat = w1.reshape(Cr, C).astype(x_nchw.dtype)                 # (Cr, C)
    params = jnp.zeros((Cr, 3), jnp.float32)
    params = params.at[:, 0].set(b1.reshape(Cr).astype(jnp.float32))
    params = params.at[:, 1].set(w2.reshape(Cr).astype(jnp.float32))
    params = params.at[0, 2].set(b2.reshape(()).astype(jnp.float32))

    const = lambda nb, pb: (0, 0)

    # VMEM: ~2x input + 2x output block buffers + tiny weights; leave headroom
    # and stay well under v7x's 64 MiB physical VMEM.
    block_bytes = bn * C * tm * elem
    vmem_limit = int(max(32 * 1024 * 1024,
                         min(48 * 1024 * 1024, 5 * block_bytes + (2 << 20))))

    out_flat = pl.pallas_call(
        pa_kernel,
        out_shape=jax.ShapeDtypeStruct((N, C, HW), x_nchw.dtype),
        grid_spec=pltpu.PrefetchScalarGridSpec(
            num_scalar_prefetch=0,
            grid=(n_batch, n_pix),
            in_specs=[
                pl.BlockSpec((bn, C, tm), lambda nb, pb: (nb, 0, pb)),
                pl.BlockSpec((Cr, C), const),
                pl.BlockSpec((Cr, 3), const),
            ],
            out_specs=pl.BlockSpec((bn, C, tm), lambda nb, pb: (nb, 0, pb)),
        ),
        compiler_params=pltpu.CompilerParams(
            dimension_semantics=("parallel", "parallel"),
            vmem_limit_bytes=vmem_limit,
        ),
    )(x_flat, w1_mat, params)

    return out_flat.reshape(N, C, H, W)


def _reference(x_nchw, w1, b1, w2, b2):
    # Plain-JAX reference of the PyTorch forward (1x1 convs as einsums).
    Cr = w1.shape[0]
    h = jnp.einsum("nchw,oc->nohw", x_nchw, w1.reshape(Cr, -1)) + b1.reshape(1, Cr, 1, 1)
    h = jnp.maximum(h, 0.0)
    y = jnp.einsum("nchw,oc->nohw", h, w2.reshape(1, Cr)) + b2.reshape(1, 1, 1, 1)
    y = jax.nn.sigmoid(y)
    return x_nchw * y


if __name__ == "__main__":
    key = jax.random.PRNGKey(0)

    def run_case(case_key, shape, **kw):
        N, C, H, W = shape
        Cr = C // 8
        kx, kw1, kb1, kw2, kb2 = jax.random.split(case_key, 5)
        x = jax.random.normal(kx, (N, C, H, W), dtype=jnp.float32)
        # Deterministic synthetic parameters (shapes match nn.Conv2d in PALayer).
        w1 = jax.random.normal(kw1, (Cr, C, 1, 1), dtype=jnp.float32) * 0.1
        b1 = jax.random.normal(kb1, (Cr,), dtype=jnp.float32) * 0.1
        w2 = jax.random.normal(kw2, (1, Cr, 1, 1), dtype=jnp.float32) * 0.1
        b2 = jax.random.normal(kb2, (1,), dtype=jnp.float32) * 0.1

        out = jax.block_until_ready(pa_layer(x, w1, b1, w2, b2, **kw))
        ref = _reference(x, w1, b1, w2, b2)
        assert out.shape == (N, C, H, W)
        assert jnp.allclose(out, ref, atol=1e-5, rtol=1e-5), f"mismatch for {shape}"

    k1, k2, k3 = jax.random.split(key, 3)
    # Small image: batch-aware grid, two grid points for v7x's two TensorCores.
    run_case(k1, (2, 32, 16, 16))
    # Pixel-tiled path with a ragged lane tail (HW = 1600, TM = 512).
    run_case(k2, (1, 16, 40, 40), target_block_bytes=32 * 1024)
    # Many tiny images: batch block > 8 -> fori_loop path inside the kernel.
    run_case(k3, (20, 16, 8, 8))

    print("KERNEL_OK")
</pallas_src>

<mosaic_0001>
module attributes {stable_mosaic.version = 11 : i64} {
  func.func @pa_kernel(%arg0: i32, %arg1: i32, %arg2: memref<1x32x256xf32, #tpu.memory_space<vmem>>, %arg3: memref<4x32xf32, #tpu.memory_space<vmem>>, %arg4: memref<4x3xf32, #tpu.memory_space<vmem>>, %arg5: memref<1x32x256xf32, #tpu.memory_space<vmem>>) attributes {dimension_semantics = [#tpu.dimension_semantics<parallel>, #tpu.dimension_semantics<parallel>], iteration_bounds = array<i64: 2, 1>, scalar_prefetch = 0 : i64, scratch_operands = 0 : i64, tpu.core_type = #tpu.core_type<tc>, window_params = [{transform_indices = @transform_0, window_bounds = array<i64: 1, 32, 256>}, {pipeline_mode = #tpu.pipeline_mode<synchronous>, transform_indices = @transform_1, window_bounds = array<i64: 4, 32>}, {pipeline_mode = #tpu.pipeline_mode<synchronous>, transform_indices = @transform_2, window_bounds = array<i64: 4, 3>}, {transform_indices = @transform_3, window_bounds = array<i64: 1, 32, 256>}]} {
    %c0 = arith.constant 0 : index
    %c0_0 = arith.constant 0 : index
    %0 = vector.load %arg3[%c0, %c0_0] : memref<4x32xf32, #tpu.memory_space<vmem>>, vector<4x32xf32>
    %c0_1 = arith.constant 0 : index
    %c0_2 = arith.constant 0 : index
    %1 = vector.load %arg4[%c0_1, %c0_2] : memref<4x3xf32, #tpu.memory_space<vmem>>, vector<4x1xf32>
    %c0_3 = arith.constant 0 : index
    %c1 = arith.constant 1 : index
    %2 = vector.load %arg4[%c0_3, %c1] : memref<4x3xf32, #tpu.memory_space<vmem>>, vector<4x1xf32>
    %c0_4 = arith.constant 0 : index
    %c2 = arith.constant 2 : index
    %3 = vector.load %arg4[%c0_4, %c2] : memref<4x3xf32, #tpu.memory_space<vmem>>, vector<1x1xf32>
    %c0_5 = arith.constant 0 : index
    %c0_6 = arith.constant 0 : index
    %c0_7 = arith.constant 0 : index
    %4 = vector.load %arg2[%c0_5, %c0_6, %c0_7] : memref<1x32x256xf32, #tpu.memory_space<vmem>>, vector<1x32x256xf32>
    %5 = vector.shape_cast %4 : vector<1x32x256xf32> to vector<32x256xf32>
    %cst = arith.constant dense<0.000000e+00> : vector<4x256xf32>
    %6 = tpu.matmul %0, %5, %cst {dimension_numbers = #tpu.dot_dimension_numbers<[1], [0], [0], [1], [0, 0, 1, 1], [], []>} : vector<4x32xf32>, vector<32x256xf32>, vector<4x256xf32> -> vector<4x256xf32>
    %7 = vector.broadcast %1 : vector<4x1xf32> to vector<4x256xf32>
    %8 = arith.addf %6, %7 : vector<4x256xf32>
    %cst_8 = arith.constant 0.000000e+00 : f32
    %9 = vector.broadcast %cst_8 : f32 to vector<4x256xf32>
    %10 = arith.maximumf %8, %9 : vector<4x256xf32>
    %11 = vector.broadcast %2 : vector<4x1xf32> to vector<4x256xf32>
    %12 = arith.mulf %10, %11 : vector<4x256xf32>
    %cst_9 = arith.constant dense<0.000000e+00> : vector<256xf32>
    %13 = vector.multi_reduction <add>, %12, %cst_9 [0] : vector<4x256xf32> to vector<256xf32>
    %14 = vector.shape_cast %13 : vector<256xf32> to vector<1x256xf32>
    %15 = vector.broadcast %3 : vector<1x1xf32> to vector<1x256xf32>
    %16 = arith.addf %14, %15 : vector<1x256xf32>
    %17 = arith.negf %16 : vector<1x256xf32>
    %18 = math.exp %17 : vector<1x256xf32>
    %cst_10 = arith.constant 1.000000e+00 : f32
    %19 = vector.broadcast %cst_10 : f32 to vector<1x256xf32>
    %20 = arith.addf %19, %18 : vector<1x256xf32>
    %21 = arith.divf %19, %20 : vector<1x256xf32>
    %22 = vector.broadcast %21 : vector<1x256xf32> to vector<32x256xf32>
    %23 = arith.mulf %5, %22 : vector<32x256xf32>
    %c0_11 = arith.constant 0 : index
    %c0_12 = arith.constant 0 : index
    %c0_13 = arith.constant 0 : index
    %24 = vector.load %arg5[%c0_11, %c0_12, %c0_13] : memref<1x32x256xf32, #tpu.memory_space<vmem>>, vector<1x32x256xf32>
    %25 = vector.shape_cast %24 : vector<1x32x256xf32> to vector<32x256xf32>
    %26 = vector.shape_cast %23 : vector<32x256xf32> to vector<1x32x256xf32>
    tpu.vector_store %arg5[%c0_11, %c0_12, %c0_13], %26 {strides = array<i32>} : memref<1x32x256xf32, #tpu.memory_space<vmem>>, vector<1x32x256xf32>,
    return
  }
  func.func @transform_0(%arg0: i32, %arg1: i32) -> (i32, i32, i32) {
    %c0_i32 = arith.constant 0 : i32
    %c0_i32_0 = arith.constant 0 : i32
    return %arg0, %c0_i32, %arg1 : i32, i32, i32
  }
  func.func @transform_1(%arg0: i32, %arg1: i32) -> (i32, i32) {
    %c0_i32 = arith.constant 0 : i32
    %c0_i32_0 = arith.constant 0 : i32
    %c0_i32_1 = arith.constant 0 : i32
    return %c0_i32, %c0_i32_0 : i32, i32
  }
  func.func @transform_2(%arg0: i32, %arg1: i32) -> (i32, i32) {
    %c0_i32 = arith.constant 0 : i32
    %c0_i32_0 = arith.constant 0 : i32
    %c0_i32_1 = arith.constant 0 : i32
    return %c0_i32, %c0_i32_0 : i32, i32
  }
  func.func @transform_3(%arg0: i32, %arg1: i32) -> (i32, i32, i32) {
    %c0_i32 = arith.constant 0 : i32
    %c0_i32_0 = arith.constant 0 : i32
    return %arg0, %c0_i32, %arg1 : i32, i32, i32
  }
}

</mosaic_0001>

<bundles_post_ra>
// kernel: tpu_custom_call.1
= control target key start
LH: loop header
LB: loop body
LE: loop exit
PB: predicated region body
PF: predicated region fallthrough
CT: control target
= control target key end

     0   :  { %s1058_s0 = inlined_call_operand.hbm [shape: f32[2,32,256], index: 0, kind: input, shape index: {}]   ;;  %s1059_s1 = inlined_call_operand.hbm [shape: f32[4,32], index: 1, kind: input, shape index: {}]   ;;  %s1060_s2 = inlined_call_operand.hbm [shape: f32[4,3], index: 2, kind: input, shape index: {}]   ;;  %s1061_s3 = inlined_call_operand.hbm [shape: f32[2,32,256], index: 3, kind: output, shape index: {}]  }
   0x1   :  { %1068 = sst [smem:[#allocation12_spill]] %s1059_s1 }
   0x2   :  { %8 = vsyncpa [#allocation3], 0 }
   0x3   :  { %10 = vsyncpa [#allocation3 + $0x1], 0 }
   0x4   :  { %11 = vsyncpa [#allocation6], 0 }
   0x5   :  { %12 = vsyncpa [#allocation4], 0 }
   0x6   :  { %14 = vsyncpa [#allocation4 + $0x1], 0  ;;  %s838_s12 = smov 0   ;;  %s840_s13 = smov 0  }
   0x7   :  { %s842_s14 = smov 0   ;;  %s844_s15 = smov 0  }
   0x8   :  { %s846_s16 = smov 0   ;;  %s848_s17 = smov 0  }
   0x9 LB: > { %s513_s18 = sadd.s32 4294967295, %s804_s17   ;;  %s514_s19 = sadd.s32 4294967294, %s804_s17   ;;  %s804_s17 = sphi %s848_s17, %s20_s17   ;;  %s800_s16 = sphi %s846_s16, %s1089_s16   ;;  %s796_s15 = sphi %s844_s15, %s1088_s15   ;;  %s792_s14 = sphi %s842_s14, %s1087_s14   ;;  %s788_s13 = sphi %s840_s13, %s1086_s13   ;;  %s784_s12 = sphi %s838_s12, %s1085_s12  }
   0xa   : > { %s41_s20 = sadd.s32 1, %s792_s14  ;;  %p48_p0 = scmp.ne.s32.totalorder %s792_s14, %s788_s13 }
   0xb   : > { %p49_p1 = scmp.eq.s32.totalorder %s804_s17, 0  ;;  %p54_p2 = scmp.ne.s32.totalorder %s788_s13, %s784_s12 }
   0xc   : > { %p876_p3 = scmp.eq.s32.totalorder %s513_s18, 0  ;;  %p122_p4 = scmp.eq.s32.totalorder %s513_s18, 1 }
   0xd   : > { %p880_p5 = por %p49_p1, %p48_p0  ;;  %p128_p6 = scmp.eq.s32.totalorder %s514_s19, 1 }
   0xe   : > { %s1069_s21 = scalar_select %p876_p3, 1, 0 }
   0xf   : > { %p886_p7 = por %p876_p3, %p54_p2  ;;  %p890_p8 = por %p122_p4, %p48_p0 }
  0x10   : > { %p894_p9 = por %p128_p6, %p54_p2  ;;  %p515_p10 = scmp.ge.s32.totalorder %s804_s17, 1 }
  0x11   : > { %s1071_s23 = scalar_select %p886_p7, 1, 0 }
  0x12   : > { %s1072_s24 = scalar_select %p890_p8, 1, 0 }
  0x13   : > { %s1073_s25 = scalar_select %p894_p9, 1, 0 }
  0x14   : > { %p135_p11 = scmp.lt.s32.totalorder %s804_s17, 3  ;;  %s806_s27 = smov [#allocation5]  }
  0x15   : > { %s148_s28 = sshll.u32 %s806_s27, 4  ;;  %p566_p1 = scmp.lt.s32.totalorder %s804_s17, 2  ;;  %s149_s28 = int_to_ptr.vmem [resolvable:$true] %s148_s28 }
  0x16   : > { %p901_p13 = pnand %p515_p10, %p135_p11  ;;  %s807_s30 = smov [#allocation7]  }
  0x17   : > { %p910_p4 = pnand %p566_p1, %p880_p5  ;;  %s159_s4 = sshll.u32 %s807_s30, 4  ;;  %s160_s4 = int_to_ptr.vmem [resolvable:$true] %s159_s4 }
  0x18   : > { %s1074_s26 = scalar_select %p901_p13, 1, 0 }
  0x19   : > { %p549_p0 = pneg %p901_p13  ;;  %s651_s6 = scalar_lea.vmem %s149_s28, 64 }
  0x1a   : > { %s1075_s29 = scalar_select %p910_p4, 1, 0 }
  0x1b   : > { %p916_p2 = pnand %p549_p0, %p876_p3  ;;  %p652_p10 = scmp.ne.s32.totalorder %s149_s28, %s651_s6 }
  0x1c   : > { %p659_p1 = scmp.lt.s32.totalorder %s149_s28, %s149_s28  ;;  %p660_p12 = scmp.lt.s32.totalorder %s651_s6, %s651_s6 }
  0x1d   : > { %p642_p6 = pneg %p916_p2 }
  0x1e   : > { %p661_p9 = por %p660_p12, %p659_p1 }
  0x1f   : > { %p654_p5 = pnand %p652_p10, %p642_p6 }
  0x21   : > { %p655_p11 = pneg %p654_p5 }
  0x23   : > { %p662_p8 = pnand %p661_p9, %p655_p11 }
  0x25   : > { %665 = shalt.err (!%p662_p8)
}
  0x26   : > { %s1077_s1 = sld [smem:[#allocation12_spill]]  ;;  %s677_s9 = scalar_lea.vmem %s160_s4, 64 }
  0x27   : > { %p678_p0 = scmp.ne.s32.totalorder %s160_s4, %s677_s9  ;;  %p685_p10 = scmp.lt.s32.totalorder %s160_s4, %s160_s4 }
  0x28   : > { %p686_p5 = scmp.lt.s32.totalorder %s677_s9, %s677_s9 }
  0x29   : > { %p680_p3 = pnand %p678_p0, %p642_p6 }
  0x2a   : > { %p687_p13 = por %p686_p5, %p685_p10 }
  0x2b   : > { %p681_p7 = pneg %p680_p3 }
  0x2c   : > { %552 = dma.hbm_to_vmem [thread:$0]  (!%p916_p2), %s1077_s1, 64, %s149_s28, [#allocation6]  }
  0x2d   : > { %p688_p4 = pnand %p687_p13, %p681_p7 }
  0x2f   : > { %691 = shalt.err (!%p688_p4)
}
  0x30   : > { %555 = dma.hbm_to_vmem [thread:$0]  (!%p916_p2), %s1060_s2, 64, %s160_s4, [#allocation6]  }
  0x31   : > { %s32_s18 = sadd.s32 1, %s800_s16  ;;  %s170_s19 = sand.u32 1, %s792_s14  }
  0x32   : > { %p34_p3 = scmp.ge.s32.totalorder %s32_s18, 2  ;;  %s519_s22 = sshll.u32 %s170_s19, 6 }
  0x33   : > { %s535_s27 = sshll.u32 %s800_s16, 10  ;;  %s174_s7 = scalar_lea.vmem [#allocation2], %s519_s22 }
  0x34   : > { %s1091_s18 = smov (%p34_p3, %s32_s18), 0  ;;  %s182_s5 = scalar_lea.hbm %s1058_s0, %s535_s27 }
  0x35   : > { %s36_s6 = ssub.s32 %s800_s16, %s1091_s18  ;;  %s183_s8 = sshll.u32 %s174_s7, 4  ;;  %s184_s8 = int_to_ptr.vmem [resolvable:$true] %s183_s8 }
  0x36   : > { %p39_p7 = scmp.eq.s32.totalorder %s36_s6, 0  ;;  %s171_s4 = scalar_lea.sflag [#allocation3], %s170_s19 }
  0x37   : > { %p1078_p8 = scmp.ne.s32.totalorder %s1075_s29, 0  ;;  %s705_s10 = scalar_lea.vmem %s184_s8, 1024 }
  0x38   : > { %s951_s9 = scalar_select %p39_p7, %s792_s14, %s41_s20  }
  0x39   : > { %p694_p9 = pneg %p1078_p8  ;;  %p706_p12 = scmp.ne.s32.totalorder %s184_s8, %s705_s10 }
  0x3a   : > { %s808_s11 = smov [#allocation2]  }
  0x3b   : > { %p708_p13 = pnand %p706_p12, %p694_p9  ;;  %s710_s1 = sshll.u32 %s808_s11, 4  ;;  %s711_s1 = int_to_ptr.vmem [resolvable:$false] %s710_s1 }
  0x3c   : > { %s712_s28 = scalar_lea.vmem %s711_s1, 2048  ;;  %p713_p2 = scmp.lt.s32.totalorder %s184_s8, %s711_s1 }
  0x3d   : > { %p709_p4 = pneg %p708_p13  ;;  %p714_p6 = scmp.lt.s32.totalorder %s712_s28, %s705_s10 }
  0x3f   : > { %p715_p11 = por %p714_p6, %p713_p2 }
  0x41   : > { %p716_p1 = pnand %p715_p11, %p709_p4 }
  0x43   : > { %719 = shalt.err (!%p716_p1)
}
  0x44   : > { %s809_s22 = smov 256   ;;  %s810_s20 = smov 16  }
  0x45   : > { %559 = dma.hbm_to_vmem [thread:$0]  (!%p1078_p8), %s182_s5, 1024, %s184_s8, %s171_s4, %s809_s22, %s809_s22, %s810_s20  }
  0x46   : > { %p1079_p0 = scmp.ne.s32.totalorder %s1074_s26, 0 }
  0x47   : > { %s960_s19 = sand.u32 (!%p1079_p0), 1, %s788_s13   ;;  %p1080_p10 = scmp.ne.s32.totalorder (!%p1079_p0), %s1071_s23, 0 }
  0x48   : > { %195 = sbr.rel (%p1079_p0) target bundleno = 359 (0x167), region = 32  ;;  %s523_s1 = sshll.u32 (!%p1079_p0), %s960_s19, 6 }
  0x49   : > { %s198_s27 = scalar_lea.sflag (!%p1079_p0), [#allocation3], %s960_s19  ;;  %s201_s30 = scalar_lea.vmem (!%p1079_p0), [#allocation2], %s523_s1 }
  0x4d   : > { %771 = dma.done.wait (%p1080_p10), %s198_s27, 1024  }
  0x4e   : > { %773 = vsyncadd (%p1080_p10), %s198_s27, 4294966272  ;;  %p1081_p5 = scmp.ne.s32.totalorder %s1069_s21, 0 }
  0x50   : > { %775 = dma.done.wait (%p1081_p5), [#allocation6], 128  }
  0x51   : > { %777 = vsyncadd (%p1081_p5), [#allocation6], 4294967168  ;;  %v811_v0 = vmov 0.0   ;;  %v812_v1 = vmov 0   ;;  %v813_v2 = vmov 2   ;;  %v974_v3 = vld [vmem:[%s201_s30 + $0x38] sm:$0xff]  ;;  %v367_v48 = vlaneseq }
  0x52   : > { %318 = vmatprep.mubr.f32.mxu0 %v811_v0  ;;  %628 = vset.pattern.permute.xlu0 %v812_v1  ;;  %v976_v4 = vld [vmem:[%s201_s30 + $0x30] sm:$0xff]  ;;  %v978_v5 = vld [vmem:[%s201_s30 + $0x28] sm:$0xff]  ;;  %v981_v6 = vld [vmem:[%s201_s30 + $0x20] sm:$0xff]  ;;  %vm250_vm0 = vcmask 261120   ;;  %v814_v14 = vmov 1   ;;  %vm333_vm1 = vcmask 1043456  }
  0x53   : > { %630 = vset.pattern.permute.xlu1 %v813_v2  ;;  %278 = vmatprep.subr.mxu0 %v974_v3  ;;  %v984_v7 = vld [vmem:[%s201_s30 + $0x18] sm:$0xff]  ;;  %v987_v8 = vld [vmem:[%s201_s30 + $0x10] sm:$0xff]  ;;  %v235_v9 = vld [vmem:[#allocation7] sm:$0xf]  ;;  %v368_v49 = vshrl.u32 %v367_v48, 7  ;;  %s536_s21 = sshll.u32 %s796_s15, 10 }
  0x54   : > { %279 = vmatpush1.msra.mxu0 %v976_v4  ;;  %v236_v10 = vld [vmem:[#allocation7] sm:$0x1]  ;;  %v990_v11 = vld [vmem:[%s201_s30 + $0x8] sm:$0xff]  ;;  %247 = vperm.xlu0 %628, %v235_v9   ;;  %v234_v13 = vld [vmem:[#allocation5] sm:$0xf]  ;;  %s231_s23 = scalar_lea.vmem [#allocation8], %s523_s1  ;;  %s1004_s6 = scalar_lea.hbm %s1061_s3, %s536_s21 }
  0x55   : > { %280 = vmatprep.subr.mxu0 %v978_v5  ;;  %v237_v12 = vld [vmem:[%s201_s30] sm:$0xff]  ;;  %350 = vperm.xlu1 %630, %v236_v10   ;;  %v369_v50 = vsub.s32 0, %v368_v49  ;;  %s407_s26 = sshll.u32 %s231_s23, 4  ;;  %s392_s15 = scalar_lea.sflag [#allocation4], %s960_s19  ;;  %s1006_s26 = int_to_ptr.vmem [resolvable:$true] %s407_s26 }
  0x56   : > { %281 = vmatpush1.msra.mxu0 %v981_v6  ;;  %s720_s7 = scalar_lea.vmem %s1006_s26, 1024  ;;  %p1082_p7 = scmp.ne.s32.totalorder %s1072_s24, 0 }
  0x57   : > { %282 = vmatprep.subr.mxu0 %v984_v7  ;;  %p721_p3 = scmp.ne.s32.totalorder %s1006_s26, %s720_s7  ;;  %s815_s8 = smov [#allocation8]  }
  0x58   : > { %283 = vmatpush1.msra.mxu0 %v987_v8  ;;  %629 = vset.pattern.permute.xlu0 %v814_v14  ;;  %s724_s4 = sshll.u32 %s815_s8, 4  ;;  %s725_s4 = int_to_ptr.vmem [resolvable:$false] %s724_s4 }
  0x59   : > { %284 = vmatprep.subr.mxu0 %v990_v11  ;;  %328 = vperm.xlu0 %629, %v235_v9   ;;  %p722_p8 = pnand %p721_p3, %p1082_p7  ;;  %s726_s10 = scalar_lea.vmem %s725_s4, 2048 }
  0x5a   : > { %285 = vmatpush1.msra.mxu0 %v237_v12  ;;  %p727_p12 = scmp.lt.s32.totalorder %s1006_s26, %s725_s4  ;;  %p728_p13 = scmp.lt.s32.totalorder %s726_s10, %s720_s7 }
  0x5b   : > { %527 = vmatmul.mubr.msk.f32.vlgmr.msra.gmra.mxu0 %vm250_vm0, %v234_v13  ;;  %p723_p9 = pneg %p722_p8 }
  0x5c   : > { %p729_p4 = por %p728_p13, %p727_p12 }
  0x5d   : > { %631 = vset.pattern.permute.xlu0 %v813_v2 }
  0x5e   : > { %p730_p2 = pnand %p729_p4, %p723_p9 }
  0xcf   : > { %v248_v15 = vpop.permute.xlu0 %247 }
  0xd0   : > { %v351_v36 = vpop.permute.xlu1 %350 }
  0xd4   : > { %v329_v19 = vpop.permute.xlu0 %328 }
 0x11b   : > { %v320_v16 = vpop.f32.mrf.mxu0 }
 0x11c   : > { %v321_v17 = vadd.f32 %v320_v16, %v248_v15 }
 0x11d   : > { %v322_v18 = vpop.f32.mrf.mxu0 }
 0x11e   : > { %v325_v20 = vmax.f32 %v321_v17, 0.0  ;;  %v323_v21 = vadd.f32 %v322_v18, %v248_v15 }
 0x120   : > { %v326_v22 = vmax.f32 %v323_v21, 0.0  ;;  %v331_v23 = vmul.f32 %v329_v19, %v325_v20 }
 0x122   : > { %v332_v24 = vmul.f32 %v329_v19, %v326_v22  ;;  %v334_v25 = vsel %vm333_vm1, %v331_v23, 0.0 }
 0x123   : > { %v335_v26 = vrot.slane %v334_v25, 4 }
 0x124   : > { %v341_v27 = vsel %vm333_vm1, %v332_v24, 0.0 }
 0x125   : > { %v336_v28 = vadd.f32 %v335_v26, %v334_v25  ;;  %v342_v29 = vrot.slane %v341_v27, 4 }
 0x127   : > { %v337_v30 = vrot.slane %v336_v28, 2  ;;  %v343_v31 = vadd.f32 %v342_v29, %v341_v27 }
 0x129   : > { %v344_v32 = vrot.slane %v343_v31, 2  ;;  %v338_v33 = vadd.f32 %v337_v30, %v336_v28 }
 0x12b   : > { %v339_v34 = vrot.slane %v338_v33, 1  ;;  %v345_v35 = vadd.f32 %v344_v32, %v343_v31 }
 0x12d   : > { %v340_v37 = vadd.f32 %v339_v34, %v338_v33  ;;  %v346_v38 = vrot.slane %v345_v35, 1 }
 0x12f   : > { %v347_v39 = vadd.f32 %v346_v38, %v345_v35  ;;  %v353_v40 = vadd.f32 %v351_v36, %v340_v37 }
 0x131   : > { %v354_v41 = vadd.f32 %v351_v36, %v347_v39  ;;  %v528_v42 = vmul.f32 -1.442695, %v353_v40 }
 0x133   : > { %632 = vpow2.f32 %v528_v42  ;;  %v529_v43 = vmul.f32 -1.442695, %v354_v41 }
 0x135   : > { %634 = vpow2.f32 %v529_v43 }
 0x140   : > { %v633_v44 = vpop.eup %632 }
 0x141   : > { %v361_v45 = vadd.f32 1.0, %v633_v44 }
 0x142   : > { %v635_v46 = vpop.eup %634 }
 0x143   : > { %v362_v47 = vadd.f32 1.0, %v635_v46  ;;  %636 = vrcp.f32 %v361_v45 }
 0x145   : > { %638 = vrcp.f32 %v362_v47 }
 0x150   : > { %v637_v51 = vpop.eup %636 }
 0x151   : > { %v370_v52 = vrot.slane %v637_v51, %v369_v50 }
 0x152   : > { %v639_v53 = vpop.eup %638 }
 0x153   : > { %v374_v54 = vrot.slane %v639_v53, %v369_v50  ;;  %v375_v55 = vmul.f32 %v370_v52, %v237_v12  ;;  %v377_v56 = vmul.f32 %v370_v52, %v987_v8  ;;  %v379_v57 = vmul.f32 %v370_v52, %v981_v6 }
 0x154   : > { %v381_v58 = vmul.f32 %v370_v52, %v976_v4 }
 0x155   : > { %v376_v59 = vmul.f32 %v374_v54, %v990_v11  ;;  %v378_v60 = vmul.f32 %v374_v54, %v984_v7  ;;  %v380_v61 = vmul.f32 %v374_v54, %v978_v5  ;;  %v382_v62 = vmul.f32 %v374_v54, %v974_v3  ;;  %383 = vst [vmem:[%s231_s23] sm:$0xff] %v375_v55 }
 0x156   : > { %385 = vst [vmem:[%s231_s23 + $0x10] sm:$0xff] %v377_v56  ;;  %387 = vst [vmem:[%s231_s23 + $0x20] sm:$0xff] %v379_v57 }
 0x157   : > { %389 = vst [vmem:[%s231_s23 + $0x30] sm:$0xff] %v381_v58  ;;  %384 = vst [vmem:[%s231_s23 + $0x8] sm:$0xff] %v376_v59 }
 0x158   : > { %386 = vst [vmem:[%s231_s23 + $0x18] sm:$0xff] %v378_v60  ;;  %388 = vst [vmem:[%s231_s23 + $0x28] sm:$0xff] %v380_v61 }
 0x159   : > { %390 = vst [vmem:[%s231_s23 + $0x38] sm:$0xff] %v382_v62 }
 0x15a   : > { %733 = shalt.err (!%p730_p2)
}
 0x15b   : > { %s734_s11 = scalar_lea.hbm %s1004_s6, 1024  ;;  %s738_s20 = scalar_lea.hbm %s1061_s3, 2048 }
 0x15c   : > { %p735_p6 = scmp.ne.s32.totalorder %s1004_s6, %s734_s11  ;;  %p739_p0 = scmp.lt.s32.totalorder %s1004_s6, %s1061_s3 }
 0x15d   : > { %p740_p10 = scmp.lt.s32.totalorder %s738_s20, %s734_s11 }
 0x15e   : > { %p736_p11 = pnand %p735_p6, %p1082_p7 }
 0x15f   : > { %p741_p5 = por %p740_p10, %p739_p0 }
 0x160   : > { %p737_p1 = pneg %p736_p11 }
 0x162   : > { %p742_p3 = pnand %p741_p5, %p737_p1 }
 0x164   : > { %745 = shalt.err (!%p742_p3)
}
 0x165   : > { %s816_s30 = smov 256   ;;  %s817_s21 = smov 16  }
 0x166   : > { %547 = dma.vmem_to_hbm [thread:$0]  (%p1082_p7), %s1006_s26, 1024, %s1004_s6, %s392_s15, %s816_s30, %s816_s30, %s817_s21  }
 0x167 PF: > { %s422_s23 = sand.u32 1, %s784_s12   ;;  %p1083_p8 = scmp.ne.s32.totalorder %s1073_s25, 0 }
 0x168   : > { %p1084_p9 = scmp.ge.s32.totalorder %s804_s17, 2  ;;  %s423_s29 = scalar_lea.sflag [#allocation4], %s422_s23 }
 0x16a   : > { %p561_p12 = pnand %p1084_p9, %p1083_p8 }
 0x16c   : > { %p562_p13 = pneg %p561_p12 }
 0x16e   : > { %779 = dma.done.wait (%p562_p13), %s423_s29, 1024  }
 0x16f   : > { %781 = vsyncadd (%p562_p13), %s423_s29, 4294966272  ;;  %s20_s17 = sadd.s32 1, %s804_s17   ;;  %s1085_s12 = smov %s788_s13 }
 0x170   : > { %p17_p4 = scmp.ge.s32.totalorder %s20_s17, 4   ;;  %s1086_s13 = smov %s792_s14 }
 0x171   : > { %s1087_s14 = smov %s951_s9  ;;  %s1088_s15 = smov %s800_s16 }
 0x172   : > { %s1089_s16 = smov %s1091_s18  ;;  %19 = sbr.rel (!%p17_p4) target bundleno = 9 (0x9), region = 85 }
 0x177   :  { %428 = vsyncpa [#allocation3], 1 }
 0x178   :  { %430 = vsyncpa [#allocation3 + $0x1], 1 }
 0x179   :  { %431 = vsyncpa [#allocation6], 1 }
 0x17a   :  { %432 = vsyncpa [#allocation4], 1 }
 0x17b   :  { %434 = vsyncpa [#allocation4 + $0x1], 1 }

</bundles_post_ra>
